<compile_context>
chip_gen: v7x
topology: tpu7x:2x2x1
jax: 0.10.0
libtpu: 0.0.40
codegen_flags: <defaults>
</compile_context>

<pallas_src>
import functools
import math

import jax
import jax.numpy as jnp
from jax.experimental import pallas as pl
from jax.experimental.pallas import tpu as pltpu


_COMPUTE_DTYPE = jnp.bfloat16          # MXU input dtype; accumulation is f32
_ROW_BAND_BYTES = 2 * 1024 * 1024      # target input bytes per row band


# ----------------------------------------------------------------------------
# Kernel: for each output row of the band, gather 9 taps into VMEM scratch and
# do one (Cout, 9*Cin) @ (9*Cin, Wo) MXU contraction (+ fused LeakyReLU).
# ----------------------------------------------------------------------------
def _conv_rows_kernel(xb_ref, w_ref, out_ref, taps_ref, *,
                      cin, wo, rows, descrs, apply_lrelu, negval):
    # xb_ref:   (1, 1, rows+halo, CG, Wpb) bf16  halo'd (phase-split) input band
    # w_ref:    (Cout, 9*cin)              bf16  packed conv weight
    # out_ref:  (1, rows, Cout, Wo)              output band (NHCW layout)
    # taps_ref: (9*cin, Wo)                bf16  per-row im2col scratch
    @pl.loop(0, rows)
    def _(r):
        for k, (cs, dh, dw) in enumerate(descrs):
            taps_ref[k * cin:(k + 1) * cin, :] = (
                xb_ref[0, 0, r + dh, cs:cs + cin, dw:dw + wo])
        acc = jnp.dot(w_ref[...], taps_ref[...],
                      preferred_element_type=jnp.float32)
        if apply_lrelu:
            acc = jnp.where(acc >= 0, acc, acc * negval)
        out_ref[0, r] = acc.astype(out_ref.dtype)


def _tap_descriptors(stride, cin):
    """(channel_start, row_offset, col_offset) per tap, kh-major / kw-minor."""
    descrs = []
    for kh in range(3):
        for kw in range(3):
            if stride == 2:
                # stride-2 tap lives in phase image (kh%2, kw%2) at offset //2
                descrs.append((((kh % 2) * 2 + (kw % 2)) * cin, kh // 2, kw // 2))
            else:
                descrs.append((0, kh, kw))
    return tuple(descrs)


# ----------------------------------------------------------------------------
# JAX-side relayout (single fused XLA pass): pad + phase split + row banding
# ----------------------------------------------------------------------------
def _prep_stride2(x_nhcw, tr, nb):
    """(N, H, C, W) -> (N, nb, tr+1, 4C, Wo+1) phase-split halo'd row bands."""
    n, h, c, w = x_nhcw.shape
    wo = (w + 1) // 2
    hpe = 2 * nb * tr + 2
    wpe = 2 * wo + 2
    xpe = jnp.pad(x_nhcw, ((0, 0), (1, hpe - h - 1), (0, 0), (1, wpe - w - 1)))
    xr = xpe.reshape(n, hpe // 2, 2, c, wpe // 2, 2)      # [n, i, ph, c, j, pw]
    xph = xr.transpose(0, 1, 2, 5, 3, 4)                  # [n, i, ph, pw, c, j]
    xph = xph.reshape(n, hpe // 2, 4 * c, wpe // 2)       # [n, i, 4C, Wo+1]
    bands = [xph[:, b * tr:b * tr + tr + 1] for b in range(nb)]
    return jnp.stack(bands, axis=1)


def _prep_stride1(x_nhcw, tr, nb):
    """(N, H, C, W) -> (N, nb, tr+2, C, W+2) zero-padded halo'd row bands."""
    n, h, c, w = x_nhcw.shape
    hp = nb * tr + 2
    xpe = jnp.pad(x_nhcw, ((0, 0), (1, hp - h - 1), (0, 0), (1, 1)))
    bands = [xpe[:, b * tr:b * tr + tr + 2] for b in range(nb)]
    return jnp.stack(bands, axis=1)


# ----------------------------------------------------------------------------
# One 3x3 conv layer (pad=1, no bias, optional fused LeakyReLU), NHCW in/out
# ----------------------------------------------------------------------------
def conv3x3_fused(x_nhcw, w9, *, stride, apply_lrelu, negval=0.2,
                  out_dtype=None):
    n, h, cin, w = x_nhcw.shape
    cout, k9 = w9.shape
    assert k9 == 9 * cin
    out_dtype = x_nhcw.dtype if out_dtype is None else out_dtype

    if stride == 2:
        ho, wo = (h + 1) // 2, (w + 1) // 2
        cg, wpb, halo = 4 * cin, wo + 1, 1
    else:
        ho, wo = h, w
        cg, wpb, halo = cin, w + 2, 2

    # Adaptive row-band size: ~_ROW_BAND_BYTES of input per band amortizes the
    # per-grid-step overhead while keeping the double-buffered set VMEM-safe.
    itemsize = jnp.dtype(_COMPUTE_DTYPE).itemsize
    in_row_bytes = cg * wpb * itemsize
    tr = max(1, min(ho, _ROW_BAND_BYTES // max(in_row_bytes, 1)))
    # v7x has 2 TensorCores: make sure the parallel grid has >= 2 points.
    if n * pl.cdiv(ho, tr) < 2 and ho >= 2:
        tr = pl.cdiv(ho, 2)
    nb = pl.cdiv(ho, tr)

    x_comp = x_nhcw.astype(_COMPUTE_DTYPE)
    xb = (_prep_stride2(x_comp, tr, nb) if stride == 2
          else _prep_stride1(x_comp, tr, nb))
    descrs = _tap_descriptors(stride, cin)

    # Layer-derived VMEM budget (double-buffered in/out + weight + taps).
    out_itemsize = jnp.dtype(out_dtype).itemsize
    in_block = (tr + halo) * in_row_bytes
    out_block = tr * cout * wo * out_itemsize
    taps_bytes = 9 * cin * ((wo + 127) // 128) * 128 * itemsize
    w_bytes = cout * k9 * w9.dtype.itemsize
    vmem_needed = 2 * (in_block + out_block) + taps_bytes + w_bytes
    vmem_limit = int(min(max(2 * vmem_needed + (8 << 20), 16 << 20), 48 << 20))

    cost = pl.CostEstimate(
        flops=2 * n * cout * k9 * ho * wo,
        transcendentals=0,
        bytes_accessed=int(xb.size * xb.dtype.itemsize
                           + w9.size * w9.dtype.itemsize
                           + n * ho * cout * wo * out_itemsize),
    )

    kernel = functools.partial(
        _conv_rows_kernel, cin=cin, wo=wo, rows=tr, descrs=descrs,
        apply_lrelu=apply_lrelu, negval=negval)

    out = pl.pallas_call(
        kernel,
        out_shape=jax.ShapeDtypeStruct((n, ho, cout, wo), out_dtype),
        grid=(n, nb),
        in_specs=[
            pl.BlockSpec((1, 1, tr + halo, cg, wpb),
                         lambda i, j: (i, j, 0, 0, 0)),
            pl.BlockSpec((cout, k9), lambda i, j: (0, 0)),
        ],
        out_specs=pl.BlockSpec((1, tr, cout, wo), lambda i, j: (i, j, 0, 0)),
        scratch_shapes=[pltpu.VMEM((9 * cin, wo), _COMPUTE_DTYPE)],
        compiler_params=pltpu.CompilerParams(
            dimension_semantics=("parallel", "parallel"),
            vmem_limit_bytes=vmem_limit,
        ),
        cost_estimate=cost,
    )(xb, w9)
    return out


# ----------------------------------------------------------------------------
# DownBlock forward: bf16 activations between layers, f32 final output (NCHW)
# ----------------------------------------------------------------------------
@functools.partial(jax.jit, static_argnums=(3,))
def _forward(x_nchw, down_w9, final_w9, negval):
    # NCHW -> NHCW keeps W on the lane axis and puts the row index on an
    # untiled leading ref axis inside the kernel.
    x = jnp.transpose(x_nchw, (0, 2, 1, 3)).astype(_COMPUTE_DTYPE)
    for w9 in down_w9:
        x = conv3x3_fused(x, w9, stride=2, apply_lrelu=True, negval=negval,
                          out_dtype=_COMPUTE_DTYPE)
    x = conv3x3_fused(x, final_w9, stride=1, apply_lrelu=False,
                      out_dtype=jnp.float32)
    return jnp.transpose(x, (0, 2, 1, 3))          # NHCW -> NCHW


def _pack_weight(w_oihw):
    """(Cout, Cin, 3, 3) f32 -> (Cout, 9*Cin) bf16 with k = (kh*3+kw)*Cin+c."""
    cout, cin = w_oihw.shape[0], w_oihw.shape[1]
    return (jnp.transpose(w_oihw, (0, 2, 3, 1))
            .reshape(cout, 9 * cin).astype(_COMPUTE_DTYPE))


class DownBlockPallas:
    def __init__(self, scale, nFeat=None, in_channels=None, out_channels=None,
                 key=None):
        self.negval = 0.2
        nFeat = 64 if nFeat is None else nFeat
        in_channels = 3 if in_channels is None else in_channels
        out_channels = 3 if out_channels is None else out_channels
        if key is None:
            key = jax.random.PRNGKey(0)

        n_down = int(math.log2(scale))
        shapes = [(nFeat, in_channels, 3, 3)]
        for _ in range(1, n_down):
            shapes.append((nFeat, nFeat, 3, 3))
        final_shape = (out_channels, nFeat, 3, 3)

        keys = jax.random.split(key, len(shapes) + 1)
        self.down_weights = [
            0.05 * jax.random.normal(k, s, jnp.float32)
            for k, s in zip(keys[:-1], shapes)
        ]
        self.final_weight = 0.05 * jax.random.normal(keys[-1], final_shape,
                                                     jnp.float32)
        # Weight packing hoisted out of the per-call path (review item).
        self.down_w9 = tuple(_pack_weight(w) for w in self.down_weights)
        self.final_w9 = _pack_weight(self.final_weight)

    def __call__(self, x_nchw):
        return _forward(x_nchw, self.down_w9, self.final_w9, self.negval)


# ----------------------------------------------------------------------------
# Pure-JAX f32 reference (lax.conv) for the correctness check
# ----------------------------------------------------------------------------
def _reference_forward(x_nchw, down_weights, final_weight, negval):
    dn = ("NCHW", "OIHW", "NCHW")
    x = x_nchw
    for w in down_weights:
        x = jax.lax.conv_general_dilated(
            x, w, (2, 2), ((1, 1), (1, 1)), dimension_numbers=dn)
        x = jnp.where(x >= 0, x, x * negval)
    x = jax.lax.conv_general_dilated(
        x, final_weight, (1, 1), ((1, 1), (1, 1)), dimension_numbers=dn)
    return x


if __name__ == "__main__":
    key = jax.random.PRNGKey(0)
    k_in, k_par = jax.random.split(key)

    # batch=2, in/out channels=3, nFeat=8, spatial 16x16, scale=4
    # (two stride-2 conv+LeakyReLU stages, then a stride-1 conv).
    x = jax.random.normal(k_in, (2, 3, 16, 16), jnp.float32)

    block = DownBlockPallas(scale=4, nFeat=8, in_channels=3, out_channels=3,
                            key=k_par)

    out = jax.block_until_ready(block(x))

    ref = jax.block_until_ready(
        _reference_forward(x, block.down_weights, block.final_weight,
                           block.negval))

    assert out.shape == (2, 3, 4, 4), out.shape
    err = float(jnp.max(jnp.abs(out - ref)))
    # bf16 inputs/weights with f32 accumulation vs f32 reference.
    assert err < 1e-2, err
    print("KERNEL_OK")
</pallas_src>

<mosaic_0001>
module attributes {stable_mosaic.version = 11 : i64} {
  func.func @_conv_rows_kernel(%arg0: i32, %arg1: i32, %arg2: memref<1x1x9x12x9xbf16, #tpu.memory_space<vmem>>, %arg3: memref<8x27xbf16, #tpu.memory_space<vmem>>, %arg4: memref<1x8x8x8xbf16, #tpu.memory_space<vmem>>, %arg5: memref<27x8xbf16, #tpu.memory_space<vmem>>) attributes {dimension_semantics = [#tpu.dimension_semantics<parallel>, #tpu.dimension_semantics<parallel>], iteration_bounds = array<i64: 2, 1>, scalar_prefetch = 0 : i64, scratch_operands = 1 : i64, tpu.core_type = #tpu.core_type<tc>, window_params = [{transform_indices = @transform_0, window_bounds = array<i64: 1, 1, 9, 12, 9>}, {pipeline_mode = #tpu.pipeline_mode<synchronous>, transform_indices = @transform_1, window_bounds = array<i64: 8, 27>}, {transform_indices = @transform_2, window_bounds = array<i64: 1, 8, 8, 8>}]} {
    %c0_i32 = arith.constant 0 : i32
    %c8_i32 = arith.constant 8 : i32
    %0 = arith.addi %c0_i32, %c8_i32 : i32
    %c1_i32 = arith.constant 1 : i32
    scf.for %arg6 = %c0_i32 to %0 step %c1_i32  : i32 {
      %c1_i32_1 = arith.constant 1 : i32
      %1 = arith.muli %arg6, %c1_i32_1 : i32
      %c0_i32_2 = arith.constant 0 : i32
      %2 = arith.addi %c0_i32_2, %1 : i32
      %c0_i32_3 = arith.constant 0 : i32
      %3 = arith.addi %2, %c0_i32_3 : i32
      %c0 = arith.constant 0 : index
      %c0_4 = arith.constant 0 : index
      %4 = arith.index_cast %3 : i32 to index
      %c0_5 = arith.constant 0 : index
      %c0_6 = arith.constant 0 : index
      %5 = vector.load %arg2[%c0, %c0_4, %4, %c0_5, %c0_6] : memref<1x1x9x12x9xbf16, #tpu.memory_space<vmem>>, vector<1x1x1x3x8xbf16>
      %6 = vector.shape_cast %5 : vector<1x1x1x3x8xbf16> to vector<3x8xbf16>
      %c0_7 = arith.constant 0 : index
      %c0_8 = arith.constant 0 : index
      %7 = vector.load %arg5[%c0_7, %c0_8] : memref<27x8xbf16, #tpu.memory_space<vmem>>, vector<3x8xbf16>
      tpu.vector_store %arg5[%c0_7, %c0_8], %6 {strides = array<i32>} : memref<27x8xbf16, #tpu.memory_space<vmem>>, vector<3x8xbf16>,
      %c0_i32_9 = arith.constant 0 : i32
      %8 = arith.addi %2, %c0_i32_9 : i32
      %c0_10 = arith.constant 0 : index
      %c0_11 = arith.constant 0 : index
      %9 = arith.index_cast %8 : i32 to index
      %c3 = arith.constant 3 : index
      %c0_12 = arith.constant 0 : index
      %10 = vector.load %arg2[%c0_10, %c0_11, %9, %c3, %c0_12] : memref<1x1x9x12x9xbf16, #tpu.memory_space<vmem>>, vector<1x1x1x3x8xbf16>
      %11 = vector.shape_cast %10 : vector<1x1x1x3x8xbf16> to vector<3x8xbf16>
      %c3_13 = arith.constant 3 : index
      %c0_14 = arith.constant 0 : index
      %12 = vector.load %arg5[%c3_13, %c0_14] : memref<27x8xbf16, #tpu.memory_space<vmem>>, vector<3x8xbf16>
      tpu.vector_store %arg5[%c3_13, %c0_14], %11 {strides = array<i32>} : memref<27x8xbf16, #tpu.memory_space<vmem>>, vector<3x8xbf16>,
      %c0_i32_15 = arith.constant 0 : i32
      %13 = arith.addi %2, %c0_i32_15 : i32
      %c0_16 = arith.constant 0 : index
      %c0_17 = arith.constant 0 : index
      %14 = arith.index_cast %13 : i32 to index
      %c0_18 = arith.constant 0 : index
      %c1 = arith.constant 1 : index
      %15 = vector.load %arg2[%c0_16, %c0_17, %14, %c0_18, %c1] : memref<1x1x9x12x9xbf16, #tpu.memory_space<vmem>>, vector<1x1x1x3x8xbf16>
      %16 = vector.shape_cast %15 : vector<1x1x1x3x8xbf16> to vector<3x8xbf16>
      %c6 = arith.constant 6 : index
      %c0_19 = arith.constant 0 : index
      %17 = vector.load %arg5[%c6, %c0_19] : memref<27x8xbf16, #tpu.memory_space<vmem>>, vector<3x8xbf16>
      tpu.vector_store %arg5[%c6, %c0_19], %16 {strides = array<i32>} : memref<27x8xbf16, #tpu.memory_space<vmem>>, vector<3x8xbf16>,
      %c0_i32_20 = arith.constant 0 : i32
      %18 = arith.addi %2, %c0_i32_20 : i32
      %c0_21 = arith.constant 0 : index
      %c0_22 = arith.constant 0 : index
      %19 = arith.index_cast %18 : i32 to index
      %c6_23 = arith.constant 6 : index
      %c0_24 = arith.constant 0 : index
      %20 = vector.load %arg2[%c0_21, %c0_22, %19, %c6_23, %c0_24] : memref<1x1x9x12x9xbf16, #tpu.memory_space<vmem>>, vector<1x1x1x3x8xbf16>
      %21 = vector.shape_cast %20 : vector<1x1x1x3x8xbf16> to vector<3x8xbf16>
      %c9 = arith.constant 9 : index
      %c0_25 = arith.constant 0 : index
      %22 = vector.load %arg5[%c9, %c0_25] : memref<27x8xbf16, #tpu.memory_space<vmem>>, vector<3x8xbf16>
      tpu.vector_store %arg5[%c9, %c0_25], %21 {strides = array<i32>} : memref<27x8xbf16, #tpu.memory_space<vmem>>, vector<3x8xbf16>,
      %c0_i32_26 = arith.constant 0 : i32
      %23 = arith.addi %2, %c0_i32_26 : i32
      %c0_27 = arith.constant 0 : index
      %c0_28 = arith.constant 0 : index
      %24 = arith.index_cast %23 : i32 to index
      %c9_29 = arith.constant 9 : index
      %c0_30 = arith.constant 0 : index
      %25 = vector.load %arg2[%c0_27, %c0_28, %24, %c9_29, %c0_30] : memref<1x1x9x12x9xbf16, #tpu.memory_space<vmem>>, vector<1x1x1x3x8xbf16>
      %26 = vector.shape_cast %25 : vector<1x1x1x3x8xbf16> to vector<3x8xbf16>
      %c12 = arith.constant 12 : index
      %c0_31 = arith.constant 0 : index
      %27 = vector.load %arg5[%c12, %c0_31] : memref<27x8xbf16, #tpu.memory_space<vmem>>, vector<3x8xbf16>
      tpu.vector_store %arg5[%c12, %c0_31], %26 {strides = array<i32>} : memref<27x8xbf16, #tpu.memory_space<vmem>>, vector<3x8xbf16>,
      %c0_i32_32 = arith.constant 0 : i32
      %28 = arith.addi %2, %c0_i32_32 : i32
      %c0_33 = arith.constant 0 : index
      %c0_34 = arith.constant 0 : index
      %29 = arith.index_cast %28 : i32 to index
      %c6_35 = arith.constant 6 : index
      %c1_36 = arith.constant 1 : index
      %30 = vector.load %arg2[%c0_33, %c0_34, %29, %c6_35, %c1_36] : memref<1x1x9x12x9xbf16, #tpu.memory_space<vmem>>, vector<1x1x1x3x8xbf16>
      %31 = vector.shape_cast %30 : vector<1x1x1x3x8xbf16> to vector<3x8xbf16>
      %c15 = arith.constant 15 : index
      %c0_37 = arith.constant 0 : index
      %32 = vector.load %arg5[%c15, %c0_37] : memref<27x8xbf16, #tpu.memory_space<vmem>>, vector<3x8xbf16>
      tpu.vector_store %arg5[%c15, %c0_37], %31 {strides = array<i32>} : memref<27x8xbf16, #tpu.memory_space<vmem>>, vector<3x8xbf16>,
      %c1_i32_38 = arith.constant 1 : i32
      %33 = arith.addi %2, %c1_i32_38 : i32
      %c0_39 = arith.constant 0 : index
      %c0_40 = arith.constant 0 : index
      %34 = arith.index_cast %33 : i32 to index
      %c0_41 = arith.constant 0 : index
      %c0_42 = arith.constant 0 : index
      %35 = vector.load %arg2[%c0_39, %c0_40, %34, %c0_41, %c0_42] : memref<1x1x9x12x9xbf16, #tpu.memory_space<vmem>>, vector<1x1x1x3x8xbf16>
      %36 = vector.shape_cast %35 : vector<1x1x1x3x8xbf16> to vector<3x8xbf16>
      %c18 = arith.constant 18 : index
      %c0_43 = arith.constant 0 : index
      %37 = vector.load %arg5[%c18, %c0_43] : memref<27x8xbf16, #tpu.memory_space<vmem>>, vector<3x8xbf16>
      tpu.vector_store %arg5[%c18, %c0_43], %36 {strides = array<i32>} : memref<27x8xbf16, #tpu.memory_space<vmem>>, vector<3x8xbf16>,
      %c1_i32_44 = arith.constant 1 : i32
      %38 = arith.addi %2, %c1_i32_44 : i32
      %c0_45 = arith.constant 0 : index
      %c0_46 = arith.constant 0 : index
      %39 = arith.index_cast %38 : i32 to index
      %c3_47 = arith.constant 3 : index
      %c0_48 = arith.constant 0 : index
      %40 = vector.load %arg2[%c0_45, %c0_46, %39, %c3_47, %c0_48] : memref<1x1x9x12x9xbf16, #tpu.memory_space<vmem>>, vector<1x1x1x3x8xbf16>
      %41 = vector.shape_cast %40 : vector<1x1x1x3x8xbf16> to vector<3x8xbf16>
      %c21 = arith.constant 21 : index
      %c0_49 = arith.constant 0 : index
      %42 = vector.load %arg5[%c21, %c0_49] : memref<27x8xbf16, #tpu.memory_space<vmem>>, vector<3x8xbf16>
      tpu.vector_store %arg5[%c21, %c0_49], %41 {strides = array<i32>} : memref<27x8xbf16, #tpu.memory_space<vmem>>, vector<3x8xbf16>,
      %c1_i32_50 = arith.constant 1 : i32
      %43 = arith.addi %2, %c1_i32_50 : i32
      %c0_51 = arith.constant 0 : index
      %c0_52 = arith.constant 0 : index
      %44 = arith.index_cast %43 : i32 to index
      %c0_53 = arith.constant 0 : index
      %c1_54 = arith.constant 1 : index
      %45 = vector.load %arg2[%c0_51, %c0_52, %44, %c0_53, %c1_54] : memref<1x1x9x12x9xbf16, #tpu.memory_space<vmem>>, vector<1x1x1x3x8xbf16>
      %46 = vector.shape_cast %45 : vector<1x1x1x3x8xbf16> to vector<3x8xbf16>
      %c24 = arith.constant 24 : index
      %c0_55 = arith.constant 0 : index
      %47 = vector.load %arg5[%c24, %c0_55] : memref<27x8xbf16, #tpu.memory_space<vmem>>, vector<3x8xbf16>
      tpu.vector_store %arg5[%c24, %c0_55], %46 {strides = array<i32>} : memref<27x8xbf16, #tpu.memory_space<vmem>>, vector<3x8xbf16>,
      %c0_56 = arith.constant 0 : index
      %c0_57 = arith.constant 0 : index
      %48 = vector.load %arg3[%c0_56, %c0_57] : memref<8x27xbf16, #tpu.memory_space<vmem>>, vector<8x27xbf16>
      %c0_58 = arith.constant 0 : index
      %c0_59 = arith.constant 0 : index
      %49 = vector.load %arg5[%c0_58, %c0_59] : memref<27x8xbf16, #tpu.memory_space<vmem>>, vector<27x8xbf16>
      %cst = arith.constant dense<0.000000e+00> : vector<8x8xf32>
      %50 = tpu.matmul %48, %49, %cst {dimension_numbers = #tpu.dot_dimension_numbers<[1], [0], [0], [1], [0, 0, 1, 1], [], []>} : vector<8x27xbf16>, vector<27x8xbf16>, vector<8x8xf32> -> vector<8x8xf32>
      %cst_60 = arith.constant 0.000000e+00 : f32
      %51 = vector.broadcast %cst_60 : f32 to vector<8x8xf32>
      %52 = arith.cmpf oge, %50, %51 : vector<8x8xf32>
      %cst_61 = arith.constant 2.000000e-01 : f32
      %53 = vector.broadcast %cst_61 : f32 to vector<8x8xf32>
      %54 = arith.mulf %50, %53 : vector<8x8xf32>
      %55 = arith.select %52, %50, %54 : vector<8x8xi1>, vector<8x8xf32>
      %56 = arith.truncf %55 : vector<8x8xf32> to vector<8x8xbf16>
      %c0_62 = arith.constant 0 : index
      %57 = arith.index_cast %2 : i32 to index
      %c0_63 = arith.constant 0 : index
      %c0_64 = arith.constant 0 : index
      %58 = vector.load %arg4[%c0_62, %57, %c0_63, %c0_64] : memref<1x8x8x8xbf16, #tpu.memory_space<vmem>>, vector<1x1x8x8xbf16>
      %59 = vector.shape_cast %58 : vector<1x1x8x8xbf16> to vector<8x8xbf16>
      %60 = vector.shape_cast %56 : vector<8x8xbf16> to vector<1x1x8x8xbf16>
      tpu.vector_store %arg4[%c0_62, %57, %c0_63, %c0_64], %60 {strides = array<i32>} : memref<1x8x8x8xbf16, #tpu.memory_space<vmem>>, vector<1x1x8x8xbf16>,
    }
    %c8_i32_0 = arith.constant 8 : i32
    return
  }
  func.func @transform_0(%arg0: i32, %arg1: i32) -> (i32, i32, i32, i32, i32) {
    %c0_i32 = arith.constant 0 : i32
    %c0_i32_0 = arith.constant 0 : i32
    %c0_i32_1 = arith.constant 0 : i32
    %c0_i32_2 = arith.constant 0 : i32
    return %arg0, %arg1, %c0_i32, %c0_i32_0, %c0_i32_1 : i32, i32, i32, i32, i32
  }
  func.func @transform_1(%arg0: i32, %arg1: i32) -> (i32, i32) {
    %c0_i32 = arith.constant 0 : i32
    %c0_i32_0 = arith.constant 0 : i32
    %c0_i32_1 = arith.constant 0 : i32
    return %c0_i32, %c0_i32_0 : i32, i32
  }
  func.func @transform_2(%arg0: i32, %arg1: i32) -> (i32, i32, i32, i32) {
    %c0_i32 = arith.constant 0 : i32
    %c0_i32_0 = arith.constant 0 : i32
    %c0_i32_1 = arith.constant 0 : i32
    return %arg0, %arg1, %c0_i32, %c0_i32_0 : i32, i32, i32, i32
  }
}

module attributes {stable_mosaic.version = 11 : i64} {
  func.func @_conv_rows_kernel(%arg0: i32, %arg1: i32, %arg2: memref<1x1x5x32x5xbf16, #tpu.memory_space<vmem>>, %arg3: memref<8x72xbf16, #tpu.memory_space<vmem>>, %arg4: memref<1x4x8x4xbf16, #tpu.memory_space<vmem>>, %arg5: memref<72x4xbf16, #tpu.memory_space<vmem>>) attributes {dimension_semantics = [#tpu.dimension_semantics<parallel>, #tpu.dimension_semantics<parallel>], iteration_bounds = array<i64: 2, 1>, scalar_prefetch = 0 : i64, scratch_operands = 1 : i64, tpu.core_type = #tpu.core_type<tc>, window_params = [{transform_indices = @transform_0, window_bounds = array<i64: 1, 1, 5, 32, 5>}, {pipeline_mode = #tpu.pipeline_mode<synchronous>, transform_indices = @transform_1, window_bounds = array<i64: 8, 72>}, {transform_indices = @transform_2, window_bounds = array<i64: 1, 4, 8, 4>}]} {
    %c0_i32 = arith.constant 0 : i32
    %c4_i32 = arith.constant 4 : i32
    %0 = arith.addi %c0_i32, %c4_i32 : i32
    %c1_i32 = arith.constant 1 : i32
    scf.for %arg6 = %c0_i32 to %0 step %c1_i32  : i32 {
      %c1_i32_1 = arith.constant 1 : i32
      %1 = arith.muli %arg6, %c1_i32_1 : i32
      %c0_i32_2 = arith.constant 0 : i32
      %2 = arith.addi %c0_i32_2, %1 : i32
      %c0_i32_3 = arith.constant 0 : i32
      %3 = arith.addi %2, %c0_i32_3 : i32
      %c0 = arith.constant 0 : index
      %c0_4 = arith.constant 0 : index
      %4 = arith.index_cast %3 : i32 to index
      %c0_5 = arith.constant 0 : index
      %c0_6 = arith.constant 0 : index
      %5 = vector.load %arg2[%c0, %c0_4, %4, %c0_5, %c0_6] : memref<1x1x5x32x5xbf16, #tpu.memory_space<vmem>>, vector<1x1x1x8x4xbf16>
      %6 = vector.shape_cast %5 : vector<1x1x1x8x4xbf16> to vector<8x4xbf16>
      %c0_7 = arith.constant 0 : index
      %c0_8 = arith.constant 0 : index
      %7 = vector.load %arg5[%c0_7, %c0_8] : memref<72x4xbf16, #tpu.memory_space<vmem>>, vector<8x4xbf16>
      tpu.vector_store %arg5[%c0_7, %c0_8], %6 {strides = array<i32>} : memref<72x4xbf16, #tpu.memory_space<vmem>>, vector<8x4xbf16>,
      %c0_i32_9 = arith.constant 0 : i32
      %8 = arith.addi %2, %c0_i32_9 : i32
      %c0_10 = arith.constant 0 : index
      %c0_11 = arith.constant 0 : index
      %9 = arith.index_cast %8 : i32 to index
      %c8 = arith.constant 8 : index
      %c0_12 = arith.constant 0 : index
      %10 = vector.load %arg2[%c0_10, %c0_11, %9, %c8, %c0_12] : memref<1x1x5x32x5xbf16, #tpu.memory_space<vmem>>, vector<1x1x1x8x4xbf16>
      %11 = vector.shape_cast %10 : vector<1x1x1x8x4xbf16> to vector<8x4xbf16>
      %c8_13 = arith.constant 8 : index
      %c0_14 = arith.constant 0 : index
      %12 = vector.load %arg5[%c8_13, %c0_14] : memref<72x4xbf16, #tpu.memory_space<vmem>>, vector<8x4xbf16>
      tpu.vector_store %arg5[%c8_13, %c0_14], %11 {strides = array<i32>} : memref<72x4xbf16, #tpu.memory_space<vmem>>, vector<8x4xbf16>,
      %c0_i32_15 = arith.constant 0 : i32
      %13 = arith.addi %2, %c0_i32_15 : i32
      %c0_16 = arith.constant 0 : index
      %c0_17 = arith.constant 0 : index
      %14 = arith.index_cast %13 : i32 to index
      %c0_18 = arith.constant 0 : index
      %c1 = arith.constant 1 : index
      %15 = vector.load %arg2[%c0_16, %c0_17, %14, %c0_18, %c1] : memref<1x1x5x32x5xbf16, #tpu.memory_space<vmem>>, vector<1x1x1x8x4xbf16>
      %16 = vector.shape_cast %15 : vector<1x1x1x8x4xbf16> to vector<8x4xbf16>
      %c16 = arith.constant 16 : index
      %c0_19 = arith.constant 0 : index
      %17 = vector.load %arg5[%c16, %c0_19] : memref<72x4xbf16, #tpu.memory_space<vmem>>, vector<8x4xbf16>
      tpu.vector_store %arg5[%c16, %c0_19], %16 {strides = array<i32>} : memref<72x4xbf16, #tpu.memory_space<vmem>>, vector<8x4xbf16>,
      %c0_i32_20 = arith.constant 0 : i32
      %18 = arith.addi %2, %c0_i32_20 : i32
      %c0_21 = arith.constant 0 : index
      %c0_22 = arith.constant 0 : index
      %19 = arith.index_cast %18 : i32 to index
      %c16_23 = arith.constant 16 : index
      %c0_24 = arith.constant 0 : index
      %20 = vector.load %arg2[%c0_21, %c0_22, %19, %c16_23, %c0_24] : memref<1x1x5x32x5xbf16, #tpu.memory_space<vmem>>, vector<1x1x1x8x4xbf16>
      %21 = vector.shape_cast %20 : vector<1x1x1x8x4xbf16> to vector<8x4xbf16>
      %c24 = arith.constant 24 : index
      %c0_25 = arith.constant 0 : index
      %22 = vector.load %arg5[%c24, %c0_25] : memref<72x4xbf16, #tpu.memory_space<vmem>>, vector<8x4xbf16>
      tpu.vector_store %arg5[%c24, %c0_25], %21 {strides = array<i32>} : memref<72x4xbf16, #tpu.memory_space<vmem>>, vector<8x4xbf16>,
      %c0_i32_26 = arith.constant 0 : i32
      %23 = arith.addi %2, %c0_i32_26 : i32
      %c0_27 = arith.constant 0 : index
      %c0_28 = arith.constant 0 : index
      %24 = arith.index_cast %23 : i32 to index
      %c24_29 = arith.constant 24 : index
      %c0_30 = arith.constant 0 : index
      %25 = vector.load %arg2[%c0_27, %c0_28, %24, %c24_29, %c0_30] : memref<1x1x5x32x5xbf16, #tpu.memory_space<vmem>>, vector<1x1x1x8x4xbf16>
      %26 = vector.shape_cast %25 : vector<1x1x1x8x4xbf16> to vector<8x4xbf16>
      %c32 = arith.constant 32 : index
      %c0_31 = arith.constant 0 : index
      %27 = vector.load %arg5[%c32, %c0_31] : memref<72x4xbf16, #tpu.memory_space<vmem>>, vector<8x4xbf16>
      tpu.vector_store %arg5[%c32, %c0_31], %26 {strides = array<i32>} : memref<72x4xbf16, #tpu.memory_space<vmem>>, vector<8x4xbf16>,
      %c0_i32_32 = arith.constant 0 : i32
      %28 = arith.addi %2, %c0_i32_32 : i32
      %c0_33 = arith.constant 0 : index
      %c0_34 = arith.constant 0 : index
      %29 = arith.index_cast %28 : i32 to index
      %c16_35 = arith.constant 16 : index
      %c1_36 = arith.constant 1 : index
      %30 = vector.load %arg2[%c0_33, %c0_34, %29, %c16_35, %c1_36] : memref<1x1x5x32x5xbf16, #tpu.memory_space<vmem>>, vector<1x1x1x8x4xbf16>
      %31 = vector.shape_cast %30 : vector<1x1x1x8x4xbf16> to vector<8x4xbf16>
      %c40 = arith.constant 40 : index
      %c0_37 = arith.constant 0 : index
      %32 = vector.load %arg5[%c40, %c0_37] : memref<72x4xbf16, #tpu.memory_space<vmem>>, vector<8x4xbf16>
      tpu.vector_store %arg5[%c40, %c0_37], %31 {strides = array<i32>} : memref<72x4xbf16, #tpu.memory_space<vmem>>, vector<8x4xbf16>,
      %c1_i32_38 = arith.constant 1 : i32
      %33 = arith.addi %2, %c1_i32_38 : i32
      %c0_39 = arith.constant 0 : index
      %c0_40 = arith.constant 0 : index
      %34 = arith.index_cast %33 : i32 to index
      %c0_41 = arith.constant 0 : index
      %c0_42 = arith.constant 0 : index
      %35 = vector.load %arg2[%c0_39, %c0_40, %34, %c0_41, %c0_42] : memref<1x1x5x32x5xbf16, #tpu.memory_space<vmem>>, vector<1x1x1x8x4xbf16>
      %36 = vector.shape_cast %35 : vector<1x1x1x8x4xbf16> to vector<8x4xbf16>
      %c48 = arith.constant 48 : index
      %c0_43 = arith.constant 0 : index
      %37 = vector.load %arg5[%c48, %c0_43] : memref<72x4xbf16, #tpu.memory_space<vmem>>, vector<8x4xbf16>
      tpu.vector_store %arg5[%c48, %c0_43], %36 {strides = array<i32>} : memref<72x4xbf16, #tpu.memory_space<vmem>>, vector<8x4xbf16>,
      %c1_i32_44 = arith.constant 1 : i32
      %38 = arith.addi %2, %c1_i32_44 : i32
      %c0_45 = arith.constant 0 : index
      %c0_46 = arith.constant 0 : index
      %39 = arith.index_cast %38 : i32 to index
      %c8_47 = arith.constant 8 : index
      %c0_48 = arith.constant 0 : index
      %40 = vector.load %arg2[%c0_45, %c0_46, %39, %c8_47, %c0_48] : memref<1x1x5x32x5xbf16, #tpu.memory_space<vmem>>, vector<1x1x1x8x4xbf16>
      %41 = vector.shape_cast %40 : vector<1x1x1x8x4xbf16> to vector<8x4xbf16>
      %c56 = arith.constant 56 : index
      %c0_49 = arith.constant 0 : index
      %42 = vector.load %arg5[%c56, %c0_49] : memref<72x4xbf16, #tpu.memory_space<vmem>>, vector<8x4xbf16>
      tpu.vector_store %arg5[%c56, %c0_49], %41 {strides = array<i32>} : memref<72x4xbf16, #tpu.memory_space<vmem>>, vector<8x4xbf16>,
      %c1_i32_50 = arith.constant 1 : i32
      %43 = arith.addi %2, %c1_i32_50 : i32
      %c0_51 = arith.constant 0 : index
      %c0_52 = arith.constant 0 : index
      %44 = arith.index_cast %43 : i32 to index
      %c0_53 = arith.constant 0 : index
      %c1_54 = arith.constant 1 : index
      %45 = vector.load %arg2[%c0_51, %c0_52, %44, %c0_53, %c1_54] : memref<1x1x5x32x5xbf16, #tpu.memory_space<vmem>>, vector<1x1x1x8x4xbf16>
      %46 = vector.shape_cast %45 : vector<1x1x1x8x4xbf16> to vector<8x4xbf16>
      %c64 = arith.constant 64 : index
      %c0_55 = arith.constant 0 : index
      %47 = vector.load %arg5[%c64, %c0_55] : memref<72x4xbf16, #tpu.memory_space<vmem>>, vector<8x4xbf16>
      tpu.vector_store %arg5[%c64, %c0_55], %46 {strides = array<i32>} : memref<72x4xbf16, #tpu.memory_space<vmem>>, vector<8x4xbf16>,
      %c0_56 = arith.constant 0 : index
      %c0_57 = arith.constant 0 : index
      %48 = vector.load %arg3[%c0_56, %c0_57] : memref<8x72xbf16, #tpu.memory_space<vmem>>, vector<8x72xbf16>
      %c0_58 = arith.constant 0 : index
      %c0_59 = arith.constant 0 : index
      %49 = vector.load %arg5[%c0_58, %c0_59] : memref<72x4xbf16, #tpu.memory_space<vmem>>, vector<72x4xbf16>
      %cst = arith.constant dense<0.000000e+00> : vector<8x4xf32>
      %50 = tpu.matmul %48, %49, %cst {dimension_numbers = #tpu.dot_dimension_numbers<[1], [0], [0], [1], [0, 0, 1, 1], [], []>} : vector<8x72xbf16>, vector<72x4xbf16>, vector<8x4xf32> -> vector<8x4xf32>
      %cst_60 = arith.constant 0.000000e+00 : f32
      %51 = vector.broadcast %cst_60 : f32 to vector<8x4xf32>
      %52 = arith.cmpf oge, %50, %51 : vector<8x4xf32>
      %cst_61 = arith.constant 2.000000e-01 : f32
      %53 = vector.broadcast %cst_61 : f32 to vector<8x4xf32>
      %54 = arith.mulf %50, %53 : vector<8x4xf32>
      %55 = arith.select %52, %50, %54 : vector<8x4xi1>, vector<8x4xf32>
      %56 = arith.truncf %55 : vector<8x4xf32> to vector<8x4xbf16>
      %c0_62 = arith.constant 0 : index
      %57 = arith.index_cast %2 : i32 to index
      %c0_63 = arith.constant 0 : index
      %c0_64 = arith.constant 0 : index
      %58 = vector.load %arg4[%c0_62, %57, %c0_63, %c0_64] : memref<1x4x8x4xbf16, #tpu.memory_space<vmem>>, vector<1x1x8x4xbf16>
      %59 = vector.shape_cast %58 : vector<1x1x8x4xbf16> to vector<8x4xbf16>
      %60 = vector.shape_cast %56 : vector<8x4xbf16> to vector<1x1x8x4xbf16>
      tpu.vector_store %arg4[%c0_62, %57, %c0_63, %c0_64], %60 {strides = array<i32>} : memref<1x4x8x4xbf16, #tpu.memory_space<vmem>>, vector<1x1x8x4xbf16>,
    }
    %c4_i32_0 = arith.constant 4 : i32
    return
  }
  func.func @transform_0(%arg0: i32, %arg1: i32) -> (i32, i32, i32, i32, i32) {
    %c0_i32 = arith.constant 0 : i32
    %c0_i32_0 = arith.constant 0 : i32
    %c0_i32_1 = arith.constant 0 : i32
    %c0_i32_2 = arith.constant 0 : i32
    return %arg0, %arg1, %c0_i32, %c0_i32_0, %c0_i32_1 : i32, i32, i32, i32, i32
  }
  func.func @transform_1(%arg0: i32, %arg1: i32) -> (i32, i32) {
    %c0_i32 = arith.constant 0 : i32
    %c0_i32_0 = arith.constant 0 : i32
    %c0_i32_1 = arith.constant 0 : i32
    return %c0_i32, %c0_i32_0 : i32, i32
  }
  func.func @transform_2(%arg0: i32, %arg1: i32) -> (i32, i32, i32, i32) {
    %c0_i32 = arith.constant 0 : i32
    %c0_i32_0 = arith.constant 0 : i32
    %c0_i32_1 = arith.constant 0 : i32
    return %arg0, %arg1, %c0_i32, %c0_i32_0 : i32, i32, i32, i32
  }
}

module attributes {stable_mosaic.version = 11 : i64} {
  func.func @_conv_rows_kernel(%arg0: i32, %arg1: i32, %arg2: memref<1x1x6x8x6xbf16, #tpu.memory_space<vmem>>, %arg3: memref<3x72xbf16, #tpu.memory_space<vmem>>, %arg4: memref<1x4x3x4xf32, #tpu.memory_space<vmem>>, %arg5: memref<72x4xbf16, #tpu.memory_space<vmem>>) attributes {dimension_semantics = [#tpu.dimension_semantics<parallel>, #tpu.dimension_semantics<parallel>], iteration_bounds = array<i64: 2, 1>, scalar_prefetch = 0 : i64, scratch_operands = 1 : i64, tpu.core_type = #tpu.core_type<tc>, window_params = [{transform_indices = @transform_0, window_bounds = array<i64: 1, 1, 6, 8, 6>}, {pipeline_mode = #tpu.pipeline_mode<synchronous>, transform_indices = @transform_1, window_bounds = array<i64: 3, 72>}, {transform_indices = @transform_2, window_bounds = array<i64: 1, 4, 3, 4>}]} {
    %c0_i32 = arith.constant 0 : i32
    %c4_i32 = arith.constant 4 : i32
    %0 = arith.addi %c0_i32, %c4_i32 : i32
    %c1_i32 = arith.constant 1 : i32
    scf.for %arg6 = %c0_i32 to %0 step %c1_i32  : i32 {
      %c1_i32_1 = arith.constant 1 : i32
      %1 = arith.muli %arg6, %c1_i32_1 : i32
      %c0_i32_2 = arith.constant 0 : i32
      %2 = arith.addi %c0_i32_2, %1 : i32
      %c0_i32_3 = arith.constant 0 : i32
      %3 = arith.addi %2, %c0_i32_3 : i32
      %c0 = arith.constant 0 : index
      %c0_4 = arith.constant 0 : index
      %4 = arith.index_cast %3 : i32 to index
      %c0_5 = arith.constant 0 : index
      %c0_6 = arith.constant 0 : index
      %5 = vector.load %arg2[%c0, %c0_4, %4, %c0_5, %c0_6] : memref<1x1x6x8x6xbf16, #tpu.memory_space<vmem>>, vector<1x1x1x8x4xbf16>
      %6 = vector.shape_cast %5 : vector<1x1x1x8x4xbf16> to vector<8x4xbf16>
      %c0_7 = arith.constant 0 : index
      %c0_8 = arith.constant 0 : index
      %7 = vector.load %arg5[%c0_7, %c0_8] : memref<72x4xbf16, #tpu.memory_space<vmem>>, vector<8x4xbf16>
      tpu.vector_store %arg5[%c0_7, %c0_8], %6 {strides = array<i32>} : memref<72x4xbf16, #tpu.memory_space<vmem>>, vector<8x4xbf16>,
      %c0_i32_9 = arith.constant 0 : i32
      %8 = arith.addi %2, %c0_i32_9 : i32
      %c0_10 = arith.constant 0 : index
      %c0_11 = arith.constant 0 : index
      %9 = arith.index_cast %8 : i32 to index
      %c0_12 = arith.constant 0 : index
      %c1 = arith.constant 1 : index
      %10 = vector.load %arg2[%c0_10, %c0_11, %9, %c0_12, %c1] : memref<1x1x6x8x6xbf16, #tpu.memory_space<vmem>>, vector<1x1x1x8x4xbf16>
      %11 = vector.shape_cast %10 : vector<1x1x1x8x4xbf16> to vector<8x4xbf16>
      %c8 = arith.constant 8 : index
      %c0_13 = arith.constant 0 : index
      %12 = vector.load %arg5[%c8, %c0_13] : memref<72x4xbf16, #tpu.memory_space<vmem>>, vector<8x4xbf16>
      tpu.vector_store %arg5[%c8, %c0_13], %11 {strides = array<i32>} : memref<72x4xbf16, #tpu.memory_space<vmem>>, vector<8x4xbf16>,
      %c0_i32_14 = arith.constant 0 : i32
      %13 = arith.addi %2, %c0_i32_14 : i32
      %c0_15 = arith.constant 0 : index
      %c0_16 = arith.constant 0 : index
      %14 = arith.index_cast %13 : i32 to index
      %c0_17 = arith.constant 0 : index
      %c2 = arith.constant 2 : index
      %15 = vector.load %arg2[%c0_15, %c0_16, %14, %c0_17, %c2] : memref<1x1x6x8x6xbf16, #tpu.memory_space<vmem>>, vector<1x1x1x8x4xbf16>
      %16 = vector.shape_cast %15 : vector<1x1x1x8x4xbf16> to vector<8x4xbf16>
      %c16 = arith.constant 16 : index
      %c0_18 = arith.constant 0 : index
      %17 = vector.load %arg5[%c16, %c0_18] : memref<72x4xbf16, #tpu.memory_space<vmem>>, vector<8x4xbf16>
      tpu.vector_store %arg5[%c16, %c0_18], %16 {strides = array<i32>} : memref<72x4xbf16, #tpu.memory_space<vmem>>, vector<8x4xbf16>,
      %c1_i32_19 = arith.constant 1 : i32
      %18 = arith.addi %2, %c1_i32_19 : i32
      %c0_20 = arith.constant 0 : index
      %c0_21 = arith.constant 0 : index
      %19 = arith.index_cast %18 : i32 to index
      %c0_22 = arith.constant 0 : index
      %c0_23 = arith.constant 0 : index
      %20 = vector.load %arg2[%c0_20, %c0_21, %19, %c0_22, %c0_23] : memref<1x1x6x8x6xbf16, #tpu.memory_space<vmem>>, vector<1x1x1x8x4xbf16>
      %21 = vector.shape_cast %20 : vector<1x1x1x8x4xbf16> to vector<8x4xbf16>
      %c24 = arith.constant 24 : index
      %c0_24 = arith.constant 0 : index
      %22 = vector.load %arg5[%c24, %c0_24] : memref<72x4xbf16, #tpu.memory_space<vmem>>, vector<8x4xbf16>
      tpu.vector_store %arg5[%c24, %c0_24], %21 {strides = array<i32>} : memref<72x4xbf16, #tpu.memory_space<vmem>>, vector<8x4xbf16>,
      %c1_i32_25 = arith.constant 1 : i32
      %23 = arith.addi %2, %c1_i32_25 : i32
      %c0_26 = arith.constant 0 : index
      %c0_27 = arith.constant 0 : index
      %24 = arith.index_cast %23 : i32 to index
      %c0_28 = arith.constant 0 : index
      %c1_29 = arith.constant 1 : index
      %25 = vector.load %arg2[%c0_26, %c0_27, %24, %c0_28, %c1_29] : memref<1x1x6x8x6xbf16, #tpu.memory_space<vmem>>, vector<1x1x1x8x4xbf16>
      %26 = vector.shape_cast %25 : vector<1x1x1x8x4xbf16> to vector<8x4xbf16>
      %c32 = arith.constant 32 : index
      %c0_30 = arith.constant 0 : index
      %27 = vector.load %arg5[%c32, %c0_30] : memref<72x4xbf16, #tpu.memory_space<vmem>>, vector<8x4xbf16>
      tpu.vector_store %arg5[%c32, %c0_30], %26 {strides = array<i32>} : memref<72x4xbf16, #tpu.memory_space<vmem>>, vector<8x4xbf16>,
      %c1_i32_31 = arith.constant 1 : i32
      %28 = arith.addi %2, %c1_i32_31 : i32
      %c0_32 = arith.constant 0 : index
      %c0_33 = arith.constant 0 : index
      %29 = arith.index_cast %28 : i32 to index
      %c0_34 = arith.constant 0 : index
      %c2_35 = arith.constant 2 : index
      %30 = vector.load %arg2[%c0_32, %c0_33, %29, %c0_34, %c2_35] : memref<1x1x6x8x6xbf16, #tpu.memory_space<vmem>>, vector<1x1x1x8x4xbf16>
      %31 = vector.shape_cast %30 : vector<1x1x1x8x4xbf16> to vector<8x4xbf16>
      %c40 = arith.constant 40 : index
      %c0_36 = arith.constant 0 : index
      %32 = vector.load %arg5[%c40, %c0_36] : memref<72x4xbf16, #tpu.memory_space<vmem>>, vector<8x4xbf16>
      tpu.vector_store %arg5[%c40, %c0_36], %31 {strides = array<i32>} : memref<72x4xbf16, #tpu.memory_space<vmem>>, vector<8x4xbf16>,
      %c2_i32 = arith.constant 2 : i32
      %33 = arith.addi %2, %c2_i32 : i32
      %c0_37 = arith.constant 0 : index
      %c0_38 = arith.constant 0 : index
      %34 = arith.index_cast %33 : i32 to index
      %c0_39 = arith.constant 0 : index
      %c0_40 = arith.constant 0 : index
      %35 = vector.load %arg2[%c0_37, %c0_38, %34, %c0_39, %c0_40] : memref<1x1x6x8x6xbf16, #tpu.memory_space<vmem>>, vector<1x1x1x8x4xbf16>
      %36 = vector.shape_cast %35 : vector<1x1x1x8x4xbf16> to vector<8x4xbf16>
      %c48 = arith.constant 48 : index
      %c0_41 = arith.constant 0 : index
      %37 = vector.load %arg5[%c48, %c0_41] : memref<72x4xbf16, #tpu.memory_space<vmem>>, vector<8x4xbf16>
      tpu.vector_store %arg5[%c48, %c0_41], %36 {strides = array<i32>} : memref<72x4xbf16, #tpu.memory_space<vmem>>, vector<8x4xbf16>,
      %c2_i32_42 = arith.constant 2 : i32
      %38 = arith.addi %2, %c2_i32_42 : i32
      %c0_43 = arith.constant 0 : index
      %c0_44 = arith.constant 0 : index
      %39 = arith.index_cast %38 : i32 to index
      %c0_45 = arith.constant 0 : index
      %c1_46 = arith.constant 1 : index
      %40 = vector.load %arg2[%c0_43, %c0_44, %39, %c0_45, %c1_46] : memref<1x1x6x8x6xbf16, #tpu.memory_space<vmem>>, vector<1x1x1x8x4xbf16>
      %41 = vector.shape_cast %40 : vector<1x1x1x8x4xbf16> to vector<8x4xbf16>
      %c56 = arith.constant 56 : index
      %c0_47 = arith.constant 0 : index
      %42 = vector.load %arg5[%c56, %c0_47] : memref<72x4xbf16, #tpu.memory_space<vmem>>, vector<8x4xbf16>
      tpu.vector_store %arg5[%c56, %c0_47], %41 {strides = array<i32>} : memref<72x4xbf16, #tpu.memory_space<vmem>>, vector<8x4xbf16>,
      %c2_i32_48 = arith.constant 2 : i32
      %43 = arith.addi %2, %c2_i32_48 : i32
      %c0_49 = arith.constant 0 : index
      %c0_50 = arith.constant 0 : index
      %44 = arith.index_cast %43 : i32 to index
      %c0_51 = arith.constant 0 : index
      %c2_52 = arith.constant 2 : index
      %45 = vector.load %arg2[%c0_49, %c0_50, %44, %c0_51, %c2_52] : memref<1x1x6x8x6xbf16, #tpu.memory_space<vmem>>, vector<1x1x1x8x4xbf16>
      %46 = vector.shape_cast %45 : vector<1x1x1x8x4xbf16> to vector<8x4xbf16>
      %c64 = arith.constant 64 : index
      %c0_53 = arith.constant 0 : index
      %47 = vector.load %arg5[%c64, %c0_53] : memref<72x4xbf16, #tpu.memory_space<vmem>>, vector<8x4xbf16>
      tpu.vector_store %arg5[%c64, %c0_53], %46 {strides = array<i32>} : memref<72x4xbf16, #tpu.memory_space<vmem>>, vector<8x4xbf16>,
      %c0_54 = arith.constant 0 : index
      %c0_55 = arith.constant 0 : index
      %48 = vector.load %arg3[%c0_54, %c0_55] : memref<3x72xbf16, #tpu.memory_space<vmem>>, vector<3x72xbf16>
      %c0_56 = arith.constant 0 : index
      %c0_57 = arith.constant 0 : index
      %49 = vector.load %arg5[%c0_56, %c0_57] : memref<72x4xbf16, #tpu.memory_space<vmem>>, vector<72x4xbf16>
      %cst = arith.constant dense<0.000000e+00> : vector<3x4xf32>
      %50 = tpu.matmul %48, %49, %cst {dimension_numbers = #tpu.dot_dimension_numbers<[1], [0], [0], [1], [0, 0, 1, 1], [], []>} : vector<3x72xbf16>, vector<72x4xbf16>, vector<3x4xf32> -> vector<3x4xf32>
      %c0_58 = arith.constant 0 : index
      %51 = arith.index_cast %2 : i32 to index
      %c0_59 = arith.constant 0 : index
      %c0_60 = arith.constant 0 : index
      %52 = vector.load %arg4[%c0_58, %51, %c0_59, %c0_60] : memref<1x4x3x4xf32, #tpu.memory_space<vmem>>, vector<1x1x3x4xf32>
      %53 = vector.shape_cast %52 : vector<1x1x3x4xf32> to vector<3x4xf32>
      %54 = vector.shape_cast %50 : vector<3x4xf32> to vector<1x1x3x4xf32>
      tpu.vector_store %arg4[%c0_58, %51, %c0_59, %c0_60], %54 {strides = array<i32>} : memref<1x4x3x4xf32, #tpu.memory_space<vmem>>, vector<1x1x3x4xf32>,
    }
    %c4_i32_0 = arith.constant 4 : i32
    return
  }
  func.func @transform_0(%arg0: i32, %arg1: i32) -> (i32, i32, i32, i32, i32) {
    %c0_i32 = arith.constant 0 : i32
    %c0_i32_0 = arith.constant 0 : i32
    %c0_i32_1 = arith.constant 0 : i32
    %c0_i32_2 = arith.constant 0 : i32
    return %arg0, %arg1, %c0_i32, %c0_i32_0, %c0_i32_1 : i32, i32, i32, i32, i32
  }
  func.func @transform_1(%arg0: i32, %arg1: i32) -> (i32, i32) {
    %c0_i32 = arith.constant 0 : i32
    %c0_i32_0 = arith.constant 0 : i32
    %c0_i32_1 = arith.constant 0 : i32
    return %c0_i32, %c0_i32_0 : i32, i32
  }
  func.func @transform_2(%arg0: i32, %arg1: i32) -> (i32, i32, i32, i32) {
    %c0_i32 = arith.constant 0 : i32
    %c0_i32_0 = arith.constant 0 : i32
    %c0_i32_1 = arith.constant 0 : i32
    return %arg0, %arg1, %c0_i32, %c0_i32_0 : i32, i32, i32, i32
  }
}

</mosaic_0001>

<bundles_post_ra>
// kernel: _forward.3
= control target key start
LH: loop header
LB: loop body
LE: loop exit
PB: predicated region body
PF: predicated region fallthrough
CT: control target
= control target key end

     0   :  { %s623_s9 = smov 0   ;;  %s625_s10 = smov 0   ;;  %s737_s0 = inlined_call_operand.vmem [shape: bf16[2,1,9,12,9], index: 0, kind: input, shape index: {}]   ;;  %s738_s1 = inlined_call_operand.vmem [shape: bf16[8,27], index: 1, kind: input, shape index: {}]   ;;  %s739_s2 = inlined_call_operand.vmem [shape: bf16[2,8,8,8], index: 2, kind: output, shape index: {}]  }
   0x1   :  { %s627_s11 = smov 0  }
   0x2 LB: > { %s24_s12 = sadd.s32 1, %s594_s10  ;;  %p503_p0 = scmp.ge.s32.totalorder %s598_s11, 1  ;;  %s598_s11 = sphi %s627_s11, %s12_s11   ;;  %s594_s10 = sphi %s625_s10, %s749_s10   ;;  %s590_s9 = sphi %s623_s9, %s748_s9  }
   0x3   : > { %p26_p1 = scmp.ge.s32.totalorder %s24_s12, 2  ;;  %p132_p2 = scmp.lt.s32.totalorder %s598_s11, 3 }
   0x5   : > { %s751_s12 = smov (%p26_p1, %s24_s12), 0  ;;  %p133_p3 = pnand %p503_p0, %p132_p2 }
   0x6   : > { %p162_p4 = scmp.lt.s32.totalorder (!%p133_p3), %s590_s9, 1  ;;  %s651_s21 = smov (!%p133_p3), 0  }
   0x7   : > { %136 = sbr.rel (%p133_p3) target bundleno = 383 (0x17f), region = 28 }
   0xe   : > { %s753_s9 = smov (!%p162_p4, %s590_s9), 1 }
   0xf   : > { %s533_s13 = smul.u32 72, %s753_s9  ;;  %s520_s14 = sshll.u32 %s753_s9, 5 }
  0x10   : > { %s644_s17 = scalar_lea.vmem %s739_s2, %s520_s14 }
  0x11   : > { %s649_s20 = scalar_lea.vmem %s737_s0, %s533_s13 }
  0x12 LB: >> { %s521_s22 = sshll.u32 %s602_s21, 3  ;;  %vm218_vm0 = vsmask.f32 256  ;;  %vm265_vm1 = vsmask.f32 4368  ;;  %vm199_vm2 = vcmask 59393   ;;  %s602_s21 = sphi %s651_s21, %s187_s21  }
  0x13   : >> { %s658_s23 = scalar_lea.vmem %s649_s20, %s521_s22  ;;  %vm258_vm3 = vsmask.f32 3328  ;;  %vm300_vm4 = vsmask.f32 2304  ;;  %v302_v4 = vld [vmem:[#allocation2 + $0x8] sm:$0x6]  ;;  %vm266_vm11 = vmor %vm218_vm0, %vm265_vm1 }
  0x14   : >> { %v205_v0 = vld [vmem:[%s658_s23] sm:$0x3]  ;;  %v263_v1 = vld [vmem:[%s658_s23] sm:$0x8]  ;;  %v264_v3 = vld [vmem:[%s658_s23 + $0x4] sm:$0x1] }
  0x15   : >> { %v207_v2 = vrot.slane %v205_v0, 5  ;;  %vm192_vm5 = vcmask 58368   ;;  %vm193_vm6 = vsmask.f32 1280  ;;  %v270_v5 = vshrl.u32 %v263_v1, 16  ;;  %s604_s24 = smov 127   ;;  %vm669_vm8 = vmand %vm199_vm2, %vm300_vm4 }
  0x16   : >> { %v247_v6 = vld [vmem:[%s658_s23 + $0x4] sm:$0x3]  ;;  %v511_v7 = vld [vmem:[%s658_s23 + $0x8] sm:$0x3]  ;;  %vm257_vm7 = vcmask 60418   ;;  %v605_v13 = vmov 0.0   ;;  %vm677_vm9 = vmand %vm192_vm5, %vm193_vm6 }
  0x17   : >> { %v208_v8 = vrot.slane %v207_v2, 4  ;;  %209 = vrot.lane.b32.xlu1 %v207_v2, %s604_s24  ;;  %v513_v9 = vld [vmem:[%s658_s23 + $0x8] sm:$0x3]  ;;  %v249_v10 = vshrl.u32 %v247_v6, 16  ;;  %v252_v11 = vshll.u32 %v247_v6, 16  ;;  %525 = vmatprep.subr.bf16.mxu0 %v605_v13  ;;  %v268_v14 = vshll.u32 %v263_v1, 16  ;;  %vm685_vm10 = vmand %vm257_vm7, %vm258_vm3 }
  0x18   : >> { %v275_v15 = vshll.u32 %v264_v3, 16  ;;  %v298_v16 = vrot.slane %v511_v7, 7  ;;  %v195_v17 = vld [vmem:[#allocation2] sm:$0x3]  ;;  %v223_v21 = vld [vmem:[%s658_s23] sm:$0x8] }
  0x19   : >> { %211 = vrot.lane.b32.xlu0 %v208_v8, %s604_s24  ;;  %v251_v18 = vrot.slane %v249_v10, 6  ;;  %v254_v19 = vrot.slane %v252_v11, 7  ;;  %v224_v22 = vld [vmem:[%s658_s23 + $0x4] sm:$0x1]  ;;  %v509_v23 = vrot.slane %v270_v5, 11  ;;  %v228_v27 = vshrl.u32 %v223_v21, 16 }
  0x1a   : >> { %v260_v25 = vld [vmem:[#allocation2 + $0x4] sm:$0xc]  ;;  %v303_v26 = vsel %vm669_vm8, %v298_v16, %v302_v4  ;;  %v231_v28 = vshll.u32 %v223_v21, 16  ;;  %v237_v30 = vshll.u32 %v224_v22, 16  ;;  %v191_v31 = vld [vmem:[%s658_s23] sm:$0x3] }
  0x1b   : >> { %316 = vrot.lane.b32.xlu1 %v513_v9, %s604_s24  ;;  %v255_v29 = vor.u32 %v254_v19, %v251_v18  ;;  %304 = vst [vmem:[#allocation2 + $0x8] sm:$0x6] %v303_v26  ;;  %v512_v32 = vld [vmem:[%s658_s23 + $0x8] sm:$0x6]  ;;  %vm225_vm12 = vsmask.f32 5392  ;;  %v196_v35 = vsel %vm677_vm9, %v191_v31, %v195_v17  ;;  %v277_v37 = vsel %vm266_vm11, %v509_v23, %v275_v15 }
  0x1c   : >> { %v230_v33 = vrot.slane %v228_v27, 6  ;;  %v233_v34 = vrot.slane %v231_v28, 7  ;;  %vm309_vm13 = vsmask.f32 7946  ;;  %197 = vst [vmem:[#allocation2] sm:$0x3] %v196_v35  ;;  %vm702_vm15 = vmor %vm193_vm6, %vm225_vm12 }
  0x1d   : >> { %278 = vrot.lane.b32.xlu0 %v268_v14, %s604_s24  ;;  %v261_v36 = vsel %vm685_vm10, %v255_v29, %v260_v25  ;;  %v239_v39 = vrot.slane %v237_v30, 7  ;;  %v307_v40 = vrot.slane %v512_v32, 7  ;;  %vm200_vm14 = vsmask.f32 7942  ;;  %vm310_vm1 = vmand %vm257_vm7, %vm309_vm13  ;;  %v198_v45 = vld [vmem:[%s658_s23] sm:$0x6] }
  0x1e   : >> { %262 = vst [vmem:[#allocation2 + $0x4] sm:$0xc] %v261_v36  ;;  %v234_v38 = vor.u32 %v233_v34, %v230_v33  ;;  %vm201_vm3 = vmand %vm199_vm2, %vm200_vm14  ;;  %vm606_vm4 = vmmov 0   ;;  %vm217_vm6 = vcmask 57344   ;;  %vm215_vm7 = vcmask 60419   ;;  %s517_s27 = sshll.u32 %s602_s21, 2 }
  0x1f   : >> { %529 = vmatprep.mubr.msk.bf16.mxu0 %vm606_vm4, %v605_v13  ;;  %vm219_vm8 = vmand %vm217_vm6, %vm218_vm0  ;;  %v220_v50 = vld [vmem:[#allocation2 + $0x4] sm:$0x1]  ;;  %vm285_vm2 = vsmask.f32 7950  ;;  %v319_v52 = vld [vmem:[#allocation2 + $0xc] sm:$0x3]  ;;  %s394_s28 = scalar_lea.vmem %s644_s17, %s517_s27 }
  0x20   : >> { %v235_v42 = vrot.slane %v234_v38, 4  ;;  %vm286_vm10 = vmand %vm215_vm7, %vm285_vm2  ;;  %vm242_vm11 = vsmask.f32 7938  ;;  %vm342_vm12 = vcmask 1044480   ;;  %vm343_vm13 = vcmask 1045504   ;;  %s187_s21 = sadd.s32 1, %s602_s21  }
  0x21   : >> { %280 = vrot.lane.b32.xlu0 %v277_v37, %s604_s24  ;;  %vm243_vm0 = vmand %vm192_vm5, %vm242_vm11  ;;  %v607_v62 = vmov 65535   ;;  %v322_v4 = vld [vmem:[%s738_s1] sm:$0xf]  ;;  %vm338_vm5 = vcmask 220160   ;;  %vm395_vm14 = vcmask 60416   ;;  %p184_p5 = scmp.ge.s32.totalorder %s187_s21, 8  }
  0x22   : >> { %v311_v43 = vld [vmem:[#allocation2 + $0x8] sm:$0xc]  ;;  %v240_v44 = vsel %vm702_vm15, %v235_v42, %v239_v39  ;;  %v344_v63 = vsel %vm342_vm12, 4294967295, %v607_v62 }
  0x23   : >> { %v312_v46 = vsel %vm310_vm1, %v307_v40, %v311_v43  ;;  %v202_v47 = vld [vmem:[#allocation2] sm:$0x6]  ;;  %v345_v1 = vsel %vm343_vm13, %v344_v63, 0 }
  0x24   : >> { %313 = vst [vmem:[#allocation2 + $0x8] sm:$0xc] %v312_v46  ;;  %v203_v48 = vsel %vm201_vm3, %v198_v45, %v202_v47 }
  0x25   : >> { %204 = vst [vmem:[#allocation2] sm:$0x6] %v203_v48  ;;  %v287_v54 = vld [vmem:[#allocation2 + $0x4] sm:$0x8] }
  0x89   : >> { %v210_v49 = vpop.permute.xlu1 %209 }
  0x8a   : >> { %216 = vst.msk [vmem:[#allocation2] sm:$0x8] %vm215_vm7, %v210_v49 }
  0x8b   : >> { %v212_v51 = vpop.permute.xlu0 %211 }
  0x8c   : >> { %v221_v53 = vsel %vm219_vm8, %v212_v51, %v220_v50 }
  0x8d   : >> { %v317_v55 = vpop.permute.xlu1 %316  ;;  %222 = vst [vmem:[#allocation2 + $0x4] sm:$0x1] %v221_v53 }
  0x8e   : >> { %v320_v56 = vsel %vm677_vm9, %v317_v55, %v319_v52 }
  0x8f   : >> { %v279_v57 = vpop.permute.xlu0 %278  ;;  %321 = vst [vmem:[#allocation2 + $0xc] sm:$0x3] %v320_v56 }
  0x90   : >> { %v288_v58 = vsel %vm286_vm10, %v279_v57, %v287_v54 }
  0x91   : >> { %289 = vst [vmem:[#allocation2 + $0x4] sm:$0x8] %v288_v58 }
  0x93   : >> { %v281_v59 = vpop.permute.xlu0 %280 }
  0x94   : >> { %v244_v60 = vld [vmem:[#allocation2 + $0x4] sm:$0x3]  ;;  %291 = vst.msk [vmem:[#allocation2 + $0x8] sm:$0x1] %vm217_vm6, %v281_v59 }
  0x95   : >> { %v245_v61 = vsel %vm243_vm0, %v240_v44, %v244_v60 }
  0x96   : >> { %246 = vst [vmem:[#allocation2 + $0x4] sm:$0x3] %v245_v61 }
  0x9b   : >> { %v571_v0 = vld [vmem:[#allocation2 + $0x8] sm:$0x3f]  }
  0x9c   : >> { %v347_v3 = vand.u32 %v571_v0, %v345_v1 }
  0x9d   : >> { %v570_v2 = vld [vmem:[#allocation2] sm:$0xff]  }
  0x9e   : >> { %526 = vmatpush3.bf16.msra.mxu0 %v570_v2 }
  0x9f   : >> { %527 = vmatprep.subr.bf16.mxu0 %v605_v13 }
  0xa2   : >> { %528 = vmatpush3.bf16.msra.mxu0 %v347_v3 }
  0xa5   : >> { %530 = vmatmul.mubr.msk.bf16.vlgmr.msra.gmra.mrb[0].mxu0 %vm338_vm5, %v322_v4 }
 0x178   : >> { %v383_v5 = vpop.f32.mrb[0].mxu0  ;;  %186 = sbr.rel (!%p184_p5) target bundleno = 18 (0x12), region = 68 }
 0x179   : >> { %vm389_vm9 = vcmp.ge.f32.partialorder %v383_v5, 0.0  ;;  %v390_v6 = vmul.f32 0.2, %v383_v5  ;;  %v531_v7 = vpop.f32.mrb[1].mxu0 }
 0x17a   : >> { %v386_v8 = vpop.f32.mrb[2].mxu0 }
 0x17b   : >> { %v391_v9 = vsel %vm389_vm9, %v383_v5, %v390_v6  ;;  %v532_v10 = vpop.f32.mrb[3].mxu0 }
 0x17c   : >> { %v392_v11 = vpack.c.bf16 %v391_v9, %v391_v9 }
 0x17e   : >> { %396 = vst.msk [vmem:[%s394_s28] sm:$0xf] %vm395_vm14, %v392_v11 }
 0x17f PF: > { %s12_s11 = sadd.s32 1, %s598_s11   ;;  %s748_s9 = smov %s594_s10 }
 0x180   : > { %p9_p6 = scmp.ge.s32.totalorder %s12_s11, 4   ;;  %s749_s10 = smov %s751_s12 }
 0x182   :  { %11 = sbr.rel (!%p9_p6) target bundleno = 2 (0x2), region = 79 }

// kernel: _forward.4
= control target key start
LH: loop header
LB: loop body
LE: loop exit
PB: predicated region body
PF: predicated region fallthrough
CT: control target
= control target key end

     0   :  { %s556_s9 = smov 0   ;;  %s558_s10 = smov 0   ;;  %s618_s0 = inlined_call_operand.vmem [shape: bf16[2,1,5,32,5], index: 0, kind: input, shape index: {}]   ;;  %s619_s1 = inlined_call_operand.vmem [shape: bf16[8,72], index: 1, kind: input, shape index: {}]   ;;  %s620_s2 = inlined_call_operand.vmem [shape: bf16[2,4,8,4], index: 2, kind: output, shape index: {}]  }
   0x1   :  { %s560_s11 = smov 0  }
   0x2 LB: > { %s24_s12 = sadd.s32 1, %s528_s10  ;;  %p424_p0 = scmp.ge.s32.totalorder %s532_s11, 1  ;;  %s532_s11 = sphi %s560_s11, %s12_s11   ;;  %s528_s10 = sphi %s558_s10, %s622_s10   ;;  %s524_s9 = sphi %s556_s9, %s621_s9  }
   0x3   : > { %p26_p1 = scmp.ge.s32.totalorder %s24_s12, 2  ;;  %p132_p2 = scmp.lt.s32.totalorder %s532_s11, 3 }
   0x5   : > { %s624_s12 = smov (%p26_p1, %s24_s12), 0  ;;  %p133_p3 = pnand %p424_p0, %p132_p2 }
   0x6   : > { %p162_p4 = scmp.lt.s32.totalorder (!%p133_p3), %s524_s9, 1  ;;  %s584_s21 = smov (!%p133_p3), 0  }
   0x7   : > { %136 = sbr.rel (%p133_p3) target bundleno = 377 (0x179), region = 28 }
   0xe   : > { %s626_s9 = smov (!%p162_p4, %s524_s9), 1 }
   0xf   : > { %s465_s13 = smul.u32 80, %s626_s9  ;;  %s443_s14 = sshll.u32 %s626_s9, 4 }
  0x10   : > { %s577_s17 = scalar_lea.vmem %s620_s2, %s443_s14 }
  0x11   : > { %s582_s20 = scalar_lea.vmem %s618_s0, %s465_s13 }
  0x12 LB: >> { %v538_v0 = vmov 0.0   ;;  %s444_s22 = sshll.u32 %s536_s21, 4  ;;  %vm192_vm0 = vcmask 27648   ;;  %s539_s24 = smov 127   ;;  %vm540_vm1 = vmmov 0   ;;  %vm267_vm2 = vcmask 1043456   ;;  %s536_s21 = sphi %s584_s21, %s187_s21  }
  0x13   : >> { %451 = vmatprep.subr.bf16.mxu0 %v538_v0  ;;  %s190_s23 = scalar_lea.vmem %s582_s20, %s444_s22  ;;  %461 = vmatprep.mubr.msk.bf16.mxu0 %vm540_vm1, %v538_v0  ;;  %v226_v19 = vld [vmem:[%s619_s1] sm:$0xf]  ;;  %vm263_vm3 = vcmask 588800   ;;  %s440_s27 = sshll.u32 %s536_s21, 2 }
  0x14   : >> { %v196_v1 = vld [vmem:[%s190_s23] sm:$0xf]  ;;  %v206_v2 = vld [vmem:[%s190_s23 + $0x8] sm:$0xf]  ;;  %v433_v3 = vld [vmem:[%s190_s23 + $0x10] sm:$0xf]  ;;  %s316_s28 = scalar_lea.vmem %s577_s17, %s440_s27 }
  0x15   : >> { %198 = vrot.lane.b32.xlu0 %v196_v1, %s539_s24  ;;  %222 = vrot.lane.b32.xlu1 %v433_v3, %s539_s24  ;;  %v191_v4 = vld [vmem:[%s190_s23] sm:$0xf]  ;;  %v194_v5 = vld [vmem:[%s190_s23 + $0x4] sm:$0xf]  ;;  %s187_s21 = sadd.s32 1, %s536_s21  }
  0x16   : >> { %193 = vst.msk [vmem:[#allocation2] sm:$0xf] %vm192_vm0, %v191_v4  ;;  %195 = vst.msk [vmem:[#allocation2 + $0x4] sm:$0xf] %vm192_vm0, %v194_v5  ;;  %v202_v6 = vld [vmem:[%s190_s23 + $0x8] sm:$0xf] }
  0x17   : >> { %v204_v7 = vld [vmem:[%s190_s23 + $0xc] sm:$0xf]  ;;  %v431_v8 = vld [vmem:[%s190_s23 + $0x10] sm:$0xf]  ;;  %203 = vst.msk [vmem:[#allocation2 + $0xc] sm:$0xf] %vm192_vm0, %v202_v6 }
  0x18   : >> { %205 = vst.msk [vmem:[#allocation2 + $0x10] sm:$0xf] %vm192_vm0, %v204_v7  ;;  %217 = vst.msk [vmem:[#allocation2 + $0x18] sm:$0xf] %vm192_vm0, %v431_v8  ;;  %v432_v9 = vld [vmem:[%s190_s23 + $0x14] sm:$0xf] }
  0x19   : >> { %219 = vst.msk [vmem:[#allocation2 + $0x1c] sm:$0xf] %vm192_vm0, %v432_v9  ;;  %208 = vrot.lane.b32.xlu0 %v206_v2, %s539_s24  ;;  %p184_p5 = scmp.ge.s32.totalorder %s187_s21, 4  }
  0x1d   : >> { %v501_v10 = vld [vmem:[#allocation2] sm:$0xff]  }
  0x1e   : >> { %452 = vmatpush3.bf16.msra.mxu0 %v501_v10 }
  0x1f   : >> { %453 = vmatprep.subr.bf16.mxu0 %v538_v0 }
  0x20   : >> { %v504_v16 = vld [vmem:[#allocation2 + $0x18] sm:$0xff]  }
  0x87   : >> { %v199_v11 = vpop.permute.xlu0 %198  ;;  %v223_v12 = vpop.permute.xlu1 %222 }
  0x88   : >> { %201 = vst.msk [vmem:[#allocation2 + $0x8] sm:$0xf] %vm192_vm0, %v199_v11  ;;  %225 = vst.msk [vmem:[#allocation2 + $0x20] sm:$0xf] %vm192_vm0, %v223_v12 }
  0x8b   : >> { %v209_v13 = vpop.permute.xlu0 %208 }
  0x8c   : >> { %211 = vst.msk [vmem:[#allocation2 + $0x14] sm:$0xf] %vm192_vm0, %v209_v13 }
  0x8f   : >> { %v502_v14 = vld [vmem:[#allocation2 + $0x8] sm:$0xff]   ;;  %v505_v17 = vld [vmem:[#allocation2 + $0x20] ss:$0 sps:$4 sm:$0xff]  }
  0x90   : >> { %454 = vmatpush3.bf16.msra.mxu0 %v502_v14  ;;  %v269_v18 = vsel %vm267_vm2, %v505_v17, 0 }
  0x91   : >> { %455 = vmatprep.subr.bf16.mxu0 %v538_v0 }
  0x93   : >> { %v503_v15 = vld [vmem:[#allocation2 + $0x10] sm:$0xff]  }
  0x94   : >> { %456 = vmatpush3.bf16.msra.mxu0 %v503_v15 }
  0x95   : >> { %457 = vmatprep.subr.bf16.mxu0 %v538_v0 }
  0x98   : >> { %458 = vmatpush3.bf16.msra.mxu0 %v504_v16 }
  0x99   : >> { %459 = vmatprep.subr.bf16.mxu0 %v538_v0 }
  0x9c   : >> { %460 = vmatpush3.bf16.msra.mxu0 %v269_v18 }
  0x9f   : >> { %462 = vmatmul.mubr.msk.bf16.vlgmr.msra.gmra.mrb[0].mxu0 %vm263_vm3, %v226_v19 }
 0x172   : >> { %v305_v20 = vpop.f32.mrb[0].mxu0  ;;  %186 = sbr.rel (!%p184_p5) target bundleno = 18 (0x12), region = 68 }
 0x173   : >> { %vm311_vm4 = vcmp.ge.f32.partialorder %v305_v20, 0.0  ;;  %v312_v21 = vmul.f32 0.2, %v305_v20  ;;  %v463_v22 = vpop.f32.mrb[1].mxu0 }
 0x174   : >> { %v308_v23 = vpop.f32.mrb[2].mxu0 }
 0x175   : >> { %v313_v24 = vsel %vm311_vm4, %v305_v20, %v312_v21  ;;  %v464_v25 = vpop.f32.mrb[3].mxu0 }
 0x176   : >> { %v314_v26 = vpack.c.bf16 %v313_v24, %v313_v24 }
 0x178   : >> { %317 = vst.msk [vmem:[%s316_s28] sm:$0xf] %vm192_vm0, %v314_v26 }
 0x179 PF: > { %s12_s11 = sadd.s32 1, %s532_s11   ;;  %s621_s9 = smov %s528_s10 }
 0x17a   : > { %p9_p6 = scmp.ge.s32.totalorder %s12_s11, 4   ;;  %s622_s10 = smov %s624_s12 }
 0x17c   :  { %11 = sbr.rel (!%p9_p6) target bundleno = 2 (0x2), region = 79 }

// kernel: _forward.5
= control target key start
LH: loop header
LB: loop body
LE: loop exit
PB: predicated region body
PF: predicated region fallthrough
CT: control target
= control target key end

     0   :  { %s573_s9 = smov 0   ;;  %s575_s10 = smov 0   ;;  %s637_s0 = inlined_call_operand.vmem [shape: bf16[2,1,6,8,6], index: 0, kind: input, shape index: {}]   ;;  %s638_s1 = inlined_call_operand.vmem [shape: bf16[3,72], index: 1, kind: input, shape index: {}]   ;;  %s639_s2 = inlined_call_operand.vmem [shape: f32[2,4,3,4], index: 2, kind: output, shape index: {}]  }
   0x1   :  { %s577_s11 = smov 0  }
   0x2 LB: > { %s24_s12 = sadd.s32 1, %s544_s10  ;;  %p437_p0 = scmp.ge.s32.totalorder %s548_s11, 1  ;;  %s548_s11 = sphi %s577_s11, %s12_s11   ;;  %s544_s10 = sphi %s575_s10, %s641_s10   ;;  %s540_s9 = sphi %s573_s9, %s640_s9  }
   0x3   : > { %p26_p1 = scmp.ge.s32.totalorder %s24_s12, 2  ;;  %p132_p2 = scmp.lt.s32.totalorder %s548_s11, 3 }
   0x5   : > { %s643_s12 = smov (%p26_p1, %s24_s12), 0  ;;  %p133_p3 = pnand %p437_p0, %p132_p2 }
   0x6   : > { %p162_p4 = scmp.lt.s32.totalorder (!%p133_p3), %s540_s9, 1  ;;  %s601_s21 = smov (!%p133_p3), 0  }
   0x7   : > { %136 = sbr.rel (%p133_p3) target bundleno = 378 (0x17a), region = 28 }
   0xe   : > { %s645_s9 = smov (!%p162_p4, %s540_s9), 1 }
   0xf   : > { %s480_s13 = smul.u32 24, %s645_s9  ;;  %s459_s14 = sshll.u32 %s645_s9, 4 }
  0x10   : > { %s594_s17 = scalar_lea.vmem %s639_s2, %s459_s14 }
  0x11   : > { %s599_s20 = scalar_lea.vmem %s637_s0, %s480_s13 }
  0x12 LB: >> { %v554_v0 = vmov 0.0   ;;  %s441_s22 = sshll.u32 %s552_s21, 2  ;;  %vm191_vm0 = vcmask 27648   ;;  %s555_s24 = smov 127   ;;  %vm557_vm1 = vmmov 0   ;;  %vm280_vm2 = vcmask 1043456   ;;  %s552_s21 = sphi %s601_s21, %s187_s21  }
  0x13   : >> { %466 = vmatprep.subr.bf16.mxu0 %v554_v0  ;;  %s189_s23 = scalar_lea.vmem %s599_s20, %s441_s22  ;;  %s556_s25 = smov 126   ;;  %476 = vmatprep.mubr.msk.bf16.mxu0 %vm557_vm1, %v554_v0  ;;  %v239_v22 = vld [vmem:[%s638_s1] sm:$0x3]  ;;  %vm276_vm3 = vcmask 588800   ;;  %vm326_vm4 = vcmask 26624  }
  0x14   : >> { %v444_v1 = vld [vmem:[%s189_s23 + $0x4] sm:$0xf]  ;;  %v193_v2 = vld [vmem:[%s189_s23] sm:$0xf]  ;;  %v447_v7 = vld [vmem:[%s189_s23 + $0x8] sm:$0xf]  ;;  %s325_s28 = scalar_lea.vmem %s594_s17, %s441_s22 }
  0x15   : >> { %212 = vrot.lane.b32.xlu1 %v444_v1, %s555_s24  ;;  %195 = vrot.lane.b32.xlu0 %v193_v2, %s555_s24  ;;  %v445_v3 = vld [vmem:[%s189_s23 + $0x4] sm:$0xf]  ;;  %v199_v4 = vld [vmem:[%s189_s23] sm:$0xf]  ;;  %226 = vst.msk [vmem:[#allocation2 + $0x18] sm:$0xf] %vm191_vm0, %v447_v7 }
  0x16   : >> { %v190_v5 = vld [vmem:[%s189_s23] sm:$0xf]  ;;  %v443_v6 = vld [vmem:[%s189_s23 + $0x4] sm:$0xf]  ;;  %v448_v8 = vld [vmem:[%s189_s23 + $0x8] sm:$0xf] }
  0x17   : >> { %192 = vst.msk [vmem:[#allocation2] sm:$0xf] %vm191_vm0, %v190_v5  ;;  %209 = vst.msk [vmem:[#allocation2 + $0xc] sm:$0xf] %vm191_vm0, %v443_v6  ;;  %v449_v9 = vld [vmem:[%s189_s23 + $0x8] sm:$0xf] }
  0x18   : >> { %s187_s21 = sadd.s32 1, %s552_s21  }
  0x19   : >> { %218 = vrot.lane.b32.xlu1 %v445_v3, %s556_s25  ;;  %201 = vrot.lane.b32.xlu0 %v199_v4, %s556_s25  ;;  %p184_p5 = scmp.ge.s32.totalorder %s187_s21, 4  }
  0x1d   : >> { %229 = vrot.lane.b32.xlu0 %v448_v8, %s555_s24  ;;  %235 = vrot.lane.b32.xlu1 %v449_v9, %s556_s25 }
  0x87   : >> { %v213_v10 = vpop.permute.xlu1 %212  ;;  %v196_v11 = vpop.permute.xlu0 %195 }
  0x88   : >> { %215 = vst.msk [vmem:[#allocation2 + $0x10] sm:$0xf] %vm191_vm0, %v213_v10  ;;  %198 = vst.msk [vmem:[#allocation2 + $0x4] sm:$0xf] %vm191_vm0, %v196_v11 }
  0x8b   : >> { %v219_v12 = vpop.permute.xlu1 %218  ;;  %v202_v13 = vpop.permute.xlu0 %201 }
  0x8c   : >> { %221 = vst.msk [vmem:[#allocation2 + $0x14] sm:$0xf] %vm191_vm0, %v219_v12  ;;  %204 = vst.msk [vmem:[#allocation2 + $0x8] sm:$0xf] %vm191_vm0, %v202_v13 }
  0x8f   : >> { %v517_v14 = vld [vmem:[#allocation2] sm:$0xff]   ;;  %v230_v15 = vpop.permute.xlu0 %229  ;;  %v236_v16 = vpop.permute.xlu1 %235 }
  0x90   : >> { %232 = vst.msk [vmem:[#allocation2 + $0x1c] sm:$0xf] %vm191_vm0, %v230_v15  ;;  %238 = vst.msk [vmem:[#allocation2 + $0x20] sm:$0xf] %vm191_vm0, %v236_v16  ;;  %467 = vmatpush3.bf16.msra.mxu0 %v517_v14 }
  0x91   : >> { %468 = vmatprep.subr.bf16.mxu0 %v554_v0 }
  0x93   : >> { %v518_v17 = vld [vmem:[#allocation2 + $0x8] sm:$0xff]   ;;  %v519_v18 = vld [vmem:[#allocation2 + $0x10] sm:$0xff]  }
  0x94   : >> { %469 = vmatpush3.bf16.msra.mxu0 %v518_v17 }
  0x95   : >> { %470 = vmatprep.subr.bf16.mxu0 %v554_v0 }
  0x97   : >> { %v520_v19 = vld [vmem:[#allocation2 + $0x18] sm:$0xff]   ;;  %v521_v20 = vld [vmem:[#allocation2 + $0x20] ss:$0 sps:$4 sm:$0xff]  }
  0x98   : >> { %471 = vmatpush3.bf16.msra.mxu0 %v519_v18  ;;  %v282_v21 = vsel %vm280_vm2, %v521_v20, 0 }
  0x99   : >> { %472 = vmatprep.subr.bf16.mxu0 %v554_v0 }
  0x9c   : >> { %473 = vmatpush3.bf16.msra.mxu0 %v520_v19 }
  0x9d   : >> { %474 = vmatprep.subr.bf16.mxu0 %v554_v0 }
  0xa0   : >> { %475 = vmatpush3.bf16.msra.mxu0 %v282_v21 }
  0xa3   : >> { %477 = vmatmul.mubr.msk.bf16.vlgmr.msra.gmra.mrb[0].mxu0 %vm276_vm3, %v239_v22 }
 0x173   : > { %186 = sbr.rel (!%p184_p5) target bundleno = 18 (0x12), region = 69 }
 0x176   : >> { %v318_v23 = vpop.f32.mrb[0].mxu0 }
 0x177   : >> { %327 = vst.msk [vmem:[%s325_s28] sm:$0x7] %vm326_vm4, %v318_v23  ;;  %v478_v24 = vpop.f32.mrb[1].mxu0 }
 0x178   : >> { %v321_v25 = vpop.f32.mrb[2].mxu0 }
 0x179   : >> { %v479_v26 = vpop.f32.mrb[3].mxu0 }
 0x17a PF: > { %s12_s11 = sadd.s32 1, %s548_s11   ;;  %s640_s9 = smov %s544_s10 }
 0x17b   : > { %p9_p6 = scmp.ge.s32.totalorder %s12_s11, 4   ;;  %s641_s10 = smov %s643_s12 }
 0x17d   :  { %11 = sbr.rel (!%p9_p6) target bundleno = 2 (0x2), region = 80 }

</bundles_post_ra>
